<compile_context>
chip_gen: v5e
topology: v5e:2x2
jax: 0.10.0
libtpu: 0.0.40
codegen_flags: <defaults>
</compile_context>

<pallas_src>
import functools

import jax
import jax.numpy as jnp
from jax import lax
from jax.experimental import pallas as pl
from jax.experimental.pallas import tpu as pltpu


def _round_up(n, m):
    return ((n + m - 1) // m) * m


def _pad_and_tile(dim, granule, cap):
    """Pad `dim` to `granule`; if it exceeds `cap`, pad to a multiple of `cap`
    and tile with `cap`, otherwise use a single full block."""
    p = _round_up(dim, granule)
    if p <= cap:
        return p, p
    p = _round_up(p, cap)
    return p, cap


def _vmem_limit_bytes():
    # v5e/v6e: 128 MiB physical VMEM (16/32 MiB scoped default); v7x: 64 MiB.
    # Leave headroom rather than hard-coding 32 MiB.
    try:
        phys = int(pltpu.get_tpu_info().vmem_capacity_bytes)
    except Exception:
        phys = 64 * 1024 * 1024
    return min(phys * 3 // 4, 96 * 1024 * 1024)


def _folded_linear_kernel(x_ref, w_ref, out_ref, acc_ref):
    # x_ref : (tb, tk) bf16   -- padded input rows
    # w_ref : (tk, tm) bf16   -- padded, pre-transposed folded weight (K, M)
    # out   : (tb, tm) f32    =  x @ W_comb^T  (batch on sublanes, M on lanes)
    k = pl.program_id(2)

    @pl.when(k == 0)
    def _init():
        acc_ref[...] = jnp.zeros_like(acc_ref)

    acc_ref[...] += jnp.dot(
        x_ref[...], w_ref[...], preferred_element_type=jnp.float32
    )

    @pl.when(k == pl.num_programs(2) - 1)
    def _store():
        # TODO(synk): on v5e a bf16 output (cast here) halves vst/HBM traffic
        # if downstream tolerates it; kept f32 for accuracy.
        out_ref[...] = acc_ref[...].astype(out_ref.dtype)


def fold_linear_net_weights(weights):
    """Fold the static weight chain ONCE (amortized across forward calls).

    Returns a dict with the pre-transposed, bf16-cast, padded folded weight
    and shape/tile metadata, or None for an empty chain (forward is x.T).

    Note: for a *one-shot* call with batch << D0 the unfused per-layer chain
    is cheaper in FLOPs; folding pays off once reused across calls.
    """
    if not weights:
        return None

    out_dim = weights[0].shape[0] if len(weights) == 1 else weights[-1].shape[0]
    d0 = weights[0].shape[1]

    # Compose in full f32 precision.
    w_comb = weights[0]
    for w in weights[1:]:
        w_comb = jnp.matmul(
            w, w_comb,
            preferred_element_type=jnp.float32,
            precision=lax.Precision.HIGHEST,
        )  # (out_dim, d0)

    # K (contraction) and M (output lane dim) padding + tile sizes.
    # Caps are multiples of 256 (v6e/v7x 256x256 MXU) and of 128 (v5e).
    k_pad, tk = _pad_and_tile(d0, granule=128, cap=512)
    m_pad, tm = _pad_and_tile(out_dim, granule=128, cap=512)

    # Pre-transpose -> (K, M), cast once to bf16, single fused pad.
    w_t = jnp.pad(
        jnp.transpose(w_comb).astype(jnp.bfloat16),
        ((0, k_pad - d0), (0, m_pad - out_dim)),
    )

    return {
        "w_t": w_t,            # (k_pad, m_pad) bf16
        "w_comb": w_comb,      # (out_dim, d0) f32, kept for validation
        "out_dim": out_dim,
        "d0": d0,
        "tm": tm,
        "tk": tk,
    }


def linear_net_forward(x, prepared):
    """Per-call path: pad/cast x, one tiled MXU matmul, slice + tiny transpose.

    x: (batch, D0) f32.  Returns (D_L, batch) f32 (PyTorch orientation)."""
    if prepared is None:                      # empty chain -> forward is x.T
        return jnp.transpose(x)

    batch, d0 = x.shape
    assert d0 == prepared["d0"], (d0, prepared["d0"])
    out_dim = prepared["out_dim"]
    w_t = prepared["w_t"]
    k_pad, m_pad = w_t.shape
    tm, tk = prepared["tm"], prepared["tk"]

    # batch sits only on the sublane axis (bf16 operand -> multiple of 16),
    # so small batches are NOT blown up to 128 lanes.
    b_pad, tb = _pad_and_tile(batch, granule=16, cap=256)

    # Single fused cast+pad (no full-size zeros buffer).
    x_p = jnp.pad(x.astype(jnp.bfloat16),
                  ((0, b_pad - batch), (0, k_pad - d0)))

    grid = (b_pad // tb, m_pad // tm, k_pad // tk)

    out_p = pl.pallas_call(
        _folded_linear_kernel,
        out_shape=jax.ShapeDtypeStruct((b_pad, m_pad), jnp.float32),
        grid_spec=pltpu.PrefetchScalarGridSpec(
            num_scalar_prefetch=0,
            grid=grid,
            in_specs=[
                # TODO(synk): on v5e consider pipeline_mode=pl.Buffered(3) on
                # these K-streamed specs to hide the lower HBM bandwidth.
                pl.BlockSpec((tb, tk), lambda i, j, k: (i, k)),
                pl.BlockSpec((tk, tm), lambda i, j, k: (k, j)),
            ],
            out_specs=pl.BlockSpec((tb, tm), lambda i, j, k: (i, j)),
            scratch_shapes=[pltpu.VMEM((tb, tm), jnp.float32)],
        ),
        compiler_params=pltpu.CompilerParams(
            dimension_semantics=("parallel", "parallel", "arbitrary"),
            vmem_limit_bytes=_vmem_limit_bytes(),
        ),
    )(x_p, w_t)

    # Strip padding and restore the PyTorch (D_L, batch) orientation; the
    # transpose is on the tiny final result, not inside the kernel.
    return jnp.transpose(out_p[:batch, :out_dim])


def init_linear_net_params(key, layer_widths):
    """Deterministic stand-in for Parameter(0.001 * torch.randn(w_i, w_{i-1}))."""
    weights = []
    for i in range(1, len(layer_widths)):
        key, sub = jax.random.split(key)
        w = 0.001 * jax.random.normal(
            sub, (layer_widths[i], layer_widths[i - 1]), dtype=jnp.float32)
        weights.append(w)
    return weights


def linear_net_reference(x, weights):
    """Pure-f32 reference matching the PyTorch forward."""
    result = jnp.transpose(x, (1, 0))
    for w in weights:
        result = jnp.matmul(w, result, precision=lax.Precision.HIGHEST)
    return result


if __name__ == "__main__":
    key = jax.random.PRNGKey(0)

    layer_widths = [32, 64, 16]   # D0 -> D1 -> D2
    batch = 8

    k_x, k_w = jax.random.split(key)
    x = jax.random.normal(k_x, (batch, layer_widths[0]), dtype=jnp.float32)
    weights = init_linear_net_params(k_w, layer_widths)

    # Fold the static weight chain once; per-call work is only the kernel.
    prepared = fold_linear_net_weights(weights)
    fwd = jax.jit(functools.partial(linear_net_forward, prepared=prepared))

    out = jax.block_until_ready(fwd(x))
    assert out.shape == (layer_widths[-1], batch), out.shape

    # (1) Tight check against a reference applying the kernel's exact
    #     quantization (bf16 operands, f32 accumulation).
    w_q = prepared["w_comb"].astype(jnp.bfloat16).astype(jnp.float32)
    x_q = x.astype(jnp.bfloat16).astype(jnp.float32)
    ref_q = jnp.matmul(w_q, jnp.transpose(x_q),
                       precision=lax.Precision.HIGHEST)
    assert jnp.allclose(out, ref_q, rtol=2e-3, atol=1e-8), \
        "mismatch vs bf16-quantized reference"

    # (2) Loose sanity check against the pure-f32 PyTorch semantics
    #     (outputs are ~1e-5 in magnitude with 0.001-scale weights).
    ref = linear_net_reference(x, weights)
    assert jnp.allclose(out, ref, rtol=5e-2, atol=1e-6), \
        "mismatch vs f32 reference"

    print("KERNEL_OK")
</pallas_src>

<mosaic_0001>
module attributes {stable_mosaic.version = 11 : i64} {
  func.func @_folded_linear_kernel(%arg0: i32, %arg1: i32, %arg2: i32, %arg3: memref<16x128xbf16, #tpu.memory_space<vmem>>, %arg4: memref<128x128xbf16, #tpu.memory_space<vmem>>, %arg5: memref<16x128xf32, #tpu.memory_space<vmem>>, %arg6: memref<16x128xf32, #tpu.memory_space<vmem>>) attributes {dimension_semantics = [#tpu.dimension_semantics<parallel>, #tpu.dimension_semantics<parallel>, #tpu.dimension_semantics<arbitrary>], iteration_bounds = array<i64: 1, 1, 1>, scalar_prefetch = 0 : i64, scratch_operands = 1 : i64, tpu.core_type = #tpu.core_type<tc>, window_params = [{transform_indices = @transform_0, window_bounds = array<i64: 16, 128>}, {transform_indices = @transform_1, window_bounds = array<i64: 128, 128>}, {transform_indices = @transform_2, window_bounds = array<i64: 16, 128>}]} {
    %c0_i32 = arith.constant 0 : i32
    %0 = arith.cmpi eq, %arg2, %c0_i32 : i32
    %1 = arith.extui %0 : i1 to i32
    %c0_i32_0 = arith.constant 0 : i32
    %2 = arith.cmpi ne, %1, %c0_i32_0 : i32
    scf.if %2 {
      %cst_10 = arith.constant 0.000000e+00 : f32
      %12 = vector.broadcast %cst_10 : f32 to vector<16x128xf32>
      %c0_11 = arith.constant 0 : index
      %c0_12 = arith.constant 0 : index
      %13 = vector.load %arg6[%c0_11, %c0_12] : memref<16x128xf32, #tpu.memory_space<vmem>>, vector<16x128xf32>
      tpu.vector_store %arg6[%c0_11, %c0_12], %12 {strides = array<i32>} : memref<16x128xf32, #tpu.memory_space<vmem>>, vector<16x128xf32>,
    } else {
    }
    %c0 = arith.constant 0 : index
    %c0_1 = arith.constant 0 : index
    %3 = vector.load %arg6[%c0, %c0_1] : memref<16x128xf32, #tpu.memory_space<vmem>>, vector<16x128xf32>
    %c0_2 = arith.constant 0 : index
    %c0_3 = arith.constant 0 : index
    %4 = vector.load %arg3[%c0_2, %c0_3] : memref<16x128xbf16, #tpu.memory_space<vmem>>, vector<16x128xbf16>
    %c0_4 = arith.constant 0 : index
    %c0_5 = arith.constant 0 : index
    %5 = vector.load %arg4[%c0_4, %c0_5] : memref<128x128xbf16, #tpu.memory_space<vmem>>, vector<128x128xbf16>
    %cst = arith.constant dense<0.000000e+00> : vector<16x128xf32>
    %6 = tpu.matmul %4, %5, %cst {dimension_numbers = #tpu.dot_dimension_numbers<[1], [0], [0], [1], [0, 0, 1, 1], [], []>} : vector<16x128xbf16>, vector<128x128xbf16>, vector<16x128xf32> -> vector<16x128xf32>
    %7 = arith.addf %3, %6 : vector<16x128xf32>
    %c0_6 = arith.constant 0 : index
    %c0_7 = arith.constant 0 : index
    %8 = vector.load %arg6[%c0_6, %c0_7] : memref<16x128xf32, #tpu.memory_space<vmem>>, vector<16x128xf32>
    tpu.vector_store %arg6[%c0_6, %c0_7], %7 {strides = array<i32>} : memref<16x128xf32, #tpu.memory_space<vmem>>, vector<16x128xf32>,
    %c0_i32_8 = arith.constant 0 : i32
    %9 = arith.cmpi eq, %arg2, %c0_i32_8 : i32
    %10 = arith.extui %9 : i1 to i32
    %c0_i32_9 = arith.constant 0 : i32
    %11 = arith.cmpi ne, %10, %c0_i32_9 : i32
    scf.if %11 {
      %c0_10 = arith.constant 0 : index
      %c0_11 = arith.constant 0 : index
      %12 = vector.load %arg6[%c0_10, %c0_11] : memref<16x128xf32, #tpu.memory_space<vmem>>, vector<16x128xf32>
      %c0_12 = arith.constant 0 : index
      %c0_13 = arith.constant 0 : index
      %13 = vector.load %arg5[%c0_12, %c0_13] : memref<16x128xf32, #tpu.memory_space<vmem>>, vector<16x128xf32>
      tpu.vector_store %arg5[%c0_12, %c0_13], %12 {strides = array<i32>} : memref<16x128xf32, #tpu.memory_space<vmem>>, vector<16x128xf32>,
    } else {
    }
    return
  }
  func.func @transform_0(%arg0: i32, %arg1: i32, %arg2: i32) -> (i32, i32) {
    %c0_i32 = arith.constant 0 : i32
    return %arg0, %arg2 : i32, i32
  }
  func.func @transform_1(%arg0: i32, %arg1: i32, %arg2: i32) -> (i32, i32) {
    %c0_i32 = arith.constant 0 : i32
    return %arg2, %arg1 : i32, i32
  }
  func.func @transform_2(%arg0: i32, %arg1: i32, %arg2: i32) -> (i32, i32) {
    %c0_i32 = arith.constant 0 : i32
    return %arg0, %arg1 : i32, i32
  }
}

</mosaic_0001>

<bundles_post_ra>
// kernel: linear_net_forward.1
= control target key start
LH: loop header
LB: loop body
LE: loop exit
PB: predicated region body
PF: predicated region fallthrough
CT: control target
= control target key end

     0   :  { %7 = vsyncpa [#allocation4], 0  ;;  %s211_s12 = smov [#allocation3]   ;;  %s212_s14 = smov 64   ;;  %s241_s0 = inlined_call_operand.vmem [shape: bf16[16,128], index: 0, kind: input, shape index: {}]   ;;  %s242_s1 = inlined_call_operand.hbm [shape: bf16[128,128], index: 1, kind: input, shape index: {}]   ;;  %s243_s2 = inlined_call_operand.vmem [shape: f32[16,128], index: 2, kind: output, shape index: {}]  }
   0x1   :  { %s14_s11 = sshll.u32 %s242_s1, 4  ;;  %s16_s13 = sshll.u32 %s211_s12, 4  ;;  %s15_s11 = int_to_ptr.hbm [resolvable:$true] %s14_s11  ;;  %s17_s13 = int_to_ptr.vmem [resolvable:$true] %s16_s13 }
   0x2   :  { %s213_s15 = smov 4  }
   0x3   :  { %22 = dma.hbm_to_vmem [thread:$0]  %s15_s11, 1024, %s17_s13, [#allocation4], %s212_s14, %s212_s14, %s213_s15  }
   0x4   :  { %209 = dma.done.wait [#allocation4], 1024  }
   0x5   :  { %210 = vsyncadd [#allocation4], 4294966272  ;;  %v181_v0 = vld [vmem:[#allocation3 + $0x38] sm:$0xff]  ;;  %v180_v1 = vld [vmem:[#allocation3 + $0x30] sm:$0xff] }
   0x6   :  { %107 = vmatpush.bf16.msra.mxu0 %v181_v0  ;;  %v179_v2 = vld [vmem:[#allocation3 + $0x28] sm:$0xff]  ;;  %v178_v3 = vld [vmem:[#allocation3 + $0x20] sm:$0xff]  ;;  %v177_v4 = vld [vmem:[#allocation3 + $0x18] sm:$0xff] }
   0x7   :  { %v176_v5 = vld [vmem:[#allocation3 + $0x10] sm:$0xff]  ;;  %v175_v6 = vld [vmem:[#allocation3 + $0x8] sm:$0xff]  ;;  %v174_v7 = vld [vmem:[#allocation3] sm:$0xff] }
   0x8   :  { %v173_v8 = vld [vmem:[%s241_s0] sm:$0xff] }
   0xa   :  { %108 = vmatpush.bf16.msra.mxu0 %v180_v1 }
   0xe   :  { %109 = vmatpush.bf16.msra.mxu0 %v179_v2 }
  0x12   :  { %110 = vmatpush.bf16.msra.mxu0 %v178_v3 }
  0x16   :  { %111 = vmatpush.bf16.msra.mxu0 %v177_v4 }
  0x1a   :  { %112 = vmatpush.bf16.msra.mxu0 %v176_v5 }
  0x1e   :  { %113 = vmatpush.bf16.msra.mxu0 %v175_v6 }
  0x22   :  { %114 = vmatpush.bf16.msra.mxu0 %v174_v7 }
  0x25   :  { %115 = vmatmul.bf16.vlgmr.msra.gmra.mxu0 %v173_v8 }
  0xa2   :  { %v116_v9 = vpop.f32.mrf.mxu0 }
  0xa3   :  { %130 = vst [vmem:[%s243_s2] sm:$0xff] %v116_v9 }
  0xaa   :  { %v118_v10 = vpop.f32.mrf.mxu0 }
  0xab   :  { %131 = vst [vmem:[%s243_s2 + $0x8] sm:$0xff] %v118_v10 }
  0xac   :  { %136 = vsyncpa [#allocation4], 1 }

</bundles_post_ra>
